<compile_context>
chip_gen: v7x
topology: tpu7x:2x2x1
jax: 0.10.0
libtpu: 0.0.40
codegen_flags: <defaults>
</compile_context>

<pallas_src>
import functools

import jax
import jax.numpy as jnp
from jax.experimental import pallas as pl
from jax.experimental.pallas import tpu as pltpu

LANE = 128
SUBLANE = 8


def _round_up(x, m):
    return ((x + m - 1) // m) * m


def _match_classify_kernel(n_classes, pack, seg_w,
                           sub_ref, rev_ref,
                           w_fc2_ref, b_fc2_ref, w_gate_ref,
                           w_fold_ref, b_fold_ref,
                           o_ref):
    """One batch tile; `pack` original rows are packed per 128-lane row.

    sub_ref/rev_ref : (T, pack*D)        packed input rows
    w_fc2_ref       : (pack*D, pack*D)   block-diag fc2 weight
    b_fc2_ref       : (1, pack*D)
    w_gate_ref      : (3, pack*D)        [w_add; w_diff; w_multi] tiled
    w_fold_ref      : (pack*D, pack*seg_w)  block-arranged folded combined@output
    b_fold_ref      : (1, pack*seg_w)
    o_ref           : (T, pack*n_classes)   softmax probabilities
    """
    # fc2 on the MXU (block-diagonal weight keeps packed rows independent).
    r = jnp.dot(rev_ref[...], w_fc2_ref[...],
                preferred_element_type=jnp.float32) + b_fc2_ref[...]
    sub = sub_ref[...].astype(jnp.float32)

    # Gating stage in f32 (VPU adds/muls + EUP tanh) at full lane utilization.
    wg = w_gate_ref[...].astype(jnp.float32)
    w_add, w_diff, w_multi = wg[0:1, :], wg[1:2, :], wg[2:3, :]
    gated = (jnp.tanh(w_add * (sub + r))
             + jnp.tanh(w_diff * (sub - r))
             + jnp.tanh(w_multi * (sub * r)))

    # Folded combined+output linear: one MXU matmul, K = pack*D.
    logits = jnp.dot(gated.astype(w_fold_ref.dtype), w_fold_ref[...],
                     preferred_element_type=jnp.float32) + b_fold_ref[...]

    # Per-packed-slot softmax over the n_classes real columns of each
    # (vreg-aligned) segment.  Exact normalization (no approx reciprocal).
    probs = []
    for j in range(pack):
        seg = logits[:, j * seg_w: j * seg_w + n_classes]
        m = jnp.max(seg, axis=-1, keepdims=True)
        e = jnp.exp(seg - m)
        den = jnp.sum(e, axis=-1, keepdims=True)
        probs.append(e / den)
    o_ref[...] = jnp.concatenate(probs, axis=-1).astype(o_ref.dtype)


@functools.partial(jax.jit, static_argnames=("b_tile", "compute_dtype"))
def match_classify(sub, rev, params, *, b_tile=4096, compute_dtype=jnp.float32):
    """Whole Match_Classify forward as one batch-tiled, pipelined Pallas call."""
    B, D = sub.shape
    C = params["w_out"].shape[1]

    # ---- fold combined -> output (valid in eval mode: no nonlinearity between) ----
    hi = jax.lax.Precision.HIGHEST
    w_fold1 = jnp.dot(params["w_comb"], params["w_out"], precision=hi)           # (D, C)
    b_fold1 = jnp.dot(params["b_comb"], params["w_out"], precision=hi) + params["b_out"]

    # ---- pack P rows per 128-lane register row (P=4 for D=32) ----
    P = LANE // D if (D <= LANE and LANE % D == 0) else 1
    SEG = _round_up(C, LANE)          # per-slot logit segment, vreg-aligned

    pad_rows = (-B) % P
    if pad_rows:                       # tiny (<P rows) pad only, never a full tile
        sub = jnp.pad(sub, ((0, pad_rows), (0, 0)))
        rev = jnp.pad(rev, ((0, pad_rows), (0, 0)))
    Bp = (B + pad_rows) // P

    sub_p = sub.reshape(Bp, P * D).astype(compute_dtype)     # contiguous: free
    rev_p = rev.reshape(Bp, P * D).astype(compute_dtype)

    eye_p = jnp.eye(P, dtype=jnp.float32)
    w_fc2_p = jnp.kron(eye_p, params["w_fc2"]).astype(compute_dtype)     # (P*D, P*D)
    b_fc2_p = jnp.tile(params["b_fc2"], (1, P)).astype(jnp.float32)      # (1, P*D)
    w_gate_p = jnp.tile(
        jnp.concatenate([params["w_add"], params["w_diff"], params["w_multi"]],
                        axis=0),
        (1, P)).astype(jnp.float32)                                      # (3, P*D)

    w_fold_seg = jnp.zeros((D, SEG), jnp.float32).at[:, :C].set(w_fold1)
    b_fold_seg = jnp.zeros((1, SEG), jnp.float32).at[:, :C].set(b_fold1)
    w_fold_p = jnp.kron(eye_p, w_fold_seg).astype(compute_dtype)         # (P*D, P*SEG)
    b_fold_p = jnp.tile(b_fold_seg, (1, P)).astype(jnp.float32)          # (1, P*SEG)

    # ---- grid: big batch tiles, ragged last block handled by Pallas ----
    tile_p = max(SUBLANE, (b_tile // P) // SUBLANE * SUBLANE)
    if Bp <= tile_p:
        tile_p = Bp            # single block == full dim -> always layout-legal
    grid = (pl.cdiv(Bp, tile_p),)

    row_spec = pl.BlockSpec((tile_p, P * D), lambda i: (i, 0))

    def pinned(arr):           # weights: block index never changes -> VMEM-resident
        return pl.BlockSpec(arr.shape, lambda i: (0, 0))

    kernel = functools.partial(_match_classify_kernel, C, P, SEG)

    out = pl.pallas_call(
        kernel,
        out_shape=jax.ShapeDtypeStruct((Bp, P * C), jnp.float32),
        grid=grid,
        in_specs=[row_spec, row_spec,
                  pinned(w_fc2_p), pinned(b_fc2_p), pinned(w_gate_p),
                  pinned(w_fold_p), pinned(b_fold_p)],
        out_specs=pl.BlockSpec((tile_p, P * C), lambda i: (i, 0)),
        compiler_params=pltpu.CompilerParams(
            dimension_semantics=("parallel",),      # v7x: shard batch over both TCs
            vmem_limit_bytes=32 * 1024 * 1024),
    )(sub_p, rev_p, w_fc2_p, b_fc2_p, w_gate_p, w_fold_p, b_fold_p)

    out = out.reshape(Bp * P, C)     # contiguous reshape: free
    return out[:B] if pad_rows else out


def make_params(key, sub_dim, rev_dim, n_classes):
    """Deterministic synthetic parameter init (mirrors module __init__ shapes)."""
    ks = jax.random.split(key, 8)
    initrange = 4.0

    # fc2: Linear(rev_dim, rev_dim); bias filled with 0 in init_weights()
    w_fc2 = jax.random.uniform(ks[0], (rev_dim, rev_dim), jnp.float32, -0.1, 0.1)
    b_fc2 = jnp.zeros((1, rev_dim), jnp.float32)

    # free weight vectors, uniform(-4, 4); broadcast as (1, D) rows
    w_add = jax.random.uniform(ks[1], (1, sub_dim), jnp.float32, -initrange, initrange)
    w_diff = jax.random.uniform(ks[2], (1, sub_dim), jnp.float32, -initrange, initrange)
    w_multi = jax.random.uniform(ks[3], (1, sub_dim), jnp.float32, -initrange, initrange)

    # combined: Linear(sub_dim, 128)
    w_comb = jax.random.uniform(ks[4], (sub_dim, 128), jnp.float32, -0.1, 0.1)
    b_comb = jax.random.uniform(ks[5], (1, 128), jnp.float32, -0.1, 0.1)

    # output: Linear(128, n_classes)
    w_out = jax.random.uniform(ks[6], (128, n_classes), jnp.float32, -0.1, 0.1)
    b_out = jax.random.uniform(ks[7], (1, n_classes), jnp.float32, -0.1, 0.1)

    return dict(w_fc2=w_fc2, b_fc2=b_fc2,
                w_add=w_add, w_diff=w_diff, w_multi=w_multi,
                w_comb=w_comb, b_comb=b_comb,
                w_out=w_out, b_out=b_out)


def reference(sub, rev, p):
    """Plain-JAX reference mirroring the PyTorch forward (softmax over dim=-1)."""
    r = rev @ p["w_fc2"] + p["b_fc2"]
    g = (jnp.tanh(p["w_add"] * (sub + r))
         + jnp.tanh(p["w_diff"] * (sub - r))
         + jnp.tanh(p["w_multi"] * (sub * r)))
    combo = g @ p["w_comb"] + p["b_comb"]
    logits = combo @ p["w_out"] + p["b_out"]
    return jax.nn.softmax(logits, axis=-1)


if __name__ == "__main__":
    # submitter_emb_dim == reviewer_emb_dim = 32, n_classes = 8 (small shapes).
    D, C = 32, 8
    key = jax.random.PRNGKey(0)
    kp, k1, k2, k3, k4 = jax.random.split(key, 5)
    params = make_params(kp, D, D, C)

    # Tolerances account for MXU default-precision f32 matmuls in the kernel vs.
    # the unfused XLA reference; normalization itself is exact.
    ATOL, RTOL = 2e-3, 1e-2

    # Case 1: batch divisible by the 4-row packing factor.
    B = 8
    sub = jax.random.normal(k1, (B, D), jnp.float32)
    rev = jax.random.normal(k2, (B, D), jnp.float32)
    out = jax.block_until_ready(match_classify(sub, rev, params))
    ref = reference(sub, rev, params)
    assert out.shape == (B, C)
    assert jnp.allclose(jnp.sum(out, axis=-1), 1.0, atol=1e-3), "rows not normalized"
    assert jnp.allclose(out, ref, atol=ATOL, rtol=RTOL), "case1 mismatch vs reference"

    # Case 2: batch not divisible by 4 (exercises the tiny row pad + trim).
    B2 = 10
    sub2 = jax.random.normal(k3, (B2, D), jnp.float32)
    rev2 = jax.random.normal(k4, (B2, D), jnp.float32)
    out2 = jax.block_until_ready(match_classify(sub2, rev2, params))
    ref2 = reference(sub2, rev2, params)
    assert out2.shape == (B2, C)
    assert jnp.allclose(out2, ref2, atol=ATOL, rtol=RTOL), "case2 mismatch vs reference"

    # Case 3: multi-step grid with a ragged last block (small b_tile forces it).
    B3 = 200
    sub3 = jax.random.normal(k1, (B3, D), jnp.float32)
    rev3 = jax.random.normal(k2, (B3, D), jnp.float32)
    out3 = jax.block_until_ready(match_classify(sub3, rev3, params, b_tile=64))
    ref3 = reference(sub3, rev3, params)
    assert out3.shape == (B3, C)
    assert jnp.allclose(out3, ref3, atol=ATOL, rtol=RTOL), "case3 mismatch vs reference"

    print("KERNEL_OK")
</pallas_src>

<mosaic_0001>
module attributes {stable_mosaic.version = 11 : i64} {
  func.func @_match_classify_kernel(%arg0: i32, %arg1: memref<2x128xf32, #tpu.memory_space<vmem>>, %arg2: memref<2x128xf32, #tpu.memory_space<vmem>>, %arg3: memref<128x128xf32, #tpu.memory_space<vmem>>, %arg4: memref<1x128xf32, #tpu.memory_space<vmem>>, %arg5: memref<3x128xf32, #tpu.memory_space<vmem>>, %arg6: memref<128x512xf32, #tpu.memory_space<vmem>>, %arg7: memref<1x512xf32, #tpu.memory_space<vmem>>, %arg8: memref<2x32xf32, #tpu.memory_space<vmem>>) attributes {dimension_semantics = [#tpu.dimension_semantics<parallel>], iteration_bounds = array<i64: 1>, scalar_prefetch = 0 : i64, scratch_operands = 0 : i64, tpu.core_type = #tpu.core_type<tc>, window_params = [{transform_indices = @transform_0, window_bounds = array<i64: 2, 128>}, {transform_indices = @transform_1, window_bounds = array<i64: 2, 128>}, {pipeline_mode = #tpu.pipeline_mode<synchronous>, transform_indices = @transform_2, window_bounds = array<i64: 128, 128>}, {pipeline_mode = #tpu.pipeline_mode<synchronous>, transform_indices = @transform_3, window_bounds = array<i64: 1, 128>}, {pipeline_mode = #tpu.pipeline_mode<synchronous>, transform_indices = @transform_4, window_bounds = array<i64: 3, 128>}, {pipeline_mode = #tpu.pipeline_mode<synchronous>, transform_indices = @transform_5, window_bounds = array<i64: 128, 512>}, {pipeline_mode = #tpu.pipeline_mode<synchronous>, transform_indices = @transform_6, window_bounds = array<i64: 1, 512>}, {transform_indices = @transform_7, window_bounds = array<i64: 2, 32>}]} {
    %c0 = arith.constant 0 : index
    %c0_0 = arith.constant 0 : index
    %0 = vector.load %arg2[%c0, %c0_0] : memref<2x128xf32, #tpu.memory_space<vmem>>, vector<2x128xf32>
    %c0_1 = arith.constant 0 : index
    %c0_2 = arith.constant 0 : index
    %1 = vector.load %arg3[%c0_1, %c0_2] : memref<128x128xf32, #tpu.memory_space<vmem>>, vector<128x128xf32>
    %cst = arith.constant dense<0.000000e+00> : vector<2x128xf32>
    %2 = tpu.matmul %0, %1, %cst {dimension_numbers = #tpu.dot_dimension_numbers<[1], [0], [0], [1], [0, 0, 1, 1], [], []>} : vector<2x128xf32>, vector<128x128xf32>, vector<2x128xf32> -> vector<2x128xf32>
    %c0_3 = arith.constant 0 : index
    %c0_4 = arith.constant 0 : index
    %3 = vector.load %arg4[%c0_3, %c0_4] : memref<1x128xf32, #tpu.memory_space<vmem>>, vector<1x128xf32>
    %4 = vector.broadcast %3 : vector<1x128xf32> to vector<2x128xf32>
    %5 = arith.addf %2, %4 : vector<2x128xf32>
    %c0_5 = arith.constant 0 : index
    %c0_6 = arith.constant 0 : index
    %6 = vector.load %arg1[%c0_5, %c0_6] : memref<2x128xf32, #tpu.memory_space<vmem>>, vector<2x128xf32>
    %c0_7 = arith.constant 0 : index
    %c0_8 = arith.constant 0 : index
    %7 = vector.load %arg5[%c0_7, %c0_8] : memref<3x128xf32, #tpu.memory_space<vmem>>, vector<3x128xf32>
    %8 = vector.extract_strided_slice %7 {offsets = [0, 0], sizes = [1, 128], strides = [1, 1]} : vector<3x128xf32> to vector<1x128xf32>
    %9 = vector.extract_strided_slice %7 {offsets = [1, 0], sizes = [1, 128], strides = [1, 1]} : vector<3x128xf32> to vector<1x128xf32>
    %10 = vector.extract_strided_slice %7 {offsets = [2, 0], sizes = [1, 128], strides = [1, 1]} : vector<3x128xf32> to vector<1x128xf32>
    %11 = arith.addf %6, %5 : vector<2x128xf32>
    %12 = vector.broadcast %8 : vector<1x128xf32> to vector<2x128xf32>
    %13 = arith.mulf %12, %11 : vector<2x128xf32>
    %14 = math.tanh %13 : vector<2x128xf32>
    %15 = arith.subf %6, %5 : vector<2x128xf32>
    %16 = vector.broadcast %9 : vector<1x128xf32> to vector<2x128xf32>
    %17 = arith.mulf %16, %15 : vector<2x128xf32>
    %18 = math.tanh %17 : vector<2x128xf32>
    %19 = arith.addf %14, %18 : vector<2x128xf32>
    %20 = arith.mulf %6, %5 : vector<2x128xf32>
    %21 = vector.broadcast %10 : vector<1x128xf32> to vector<2x128xf32>
    %22 = arith.mulf %21, %20 : vector<2x128xf32>
    %23 = math.tanh %22 : vector<2x128xf32>
    %24 = arith.addf %19, %23 : vector<2x128xf32>
    %c0_9 = arith.constant 0 : index
    %c0_10 = arith.constant 0 : index
    %25 = vector.load %arg6[%c0_9, %c0_10] : memref<128x512xf32, #tpu.memory_space<vmem>>, vector<128x512xf32>
    %cst_11 = arith.constant dense<0.000000e+00> : vector<2x512xf32>
    %26 = tpu.matmul %24, %25, %cst_11 {dimension_numbers = #tpu.dot_dimension_numbers<[1], [0], [0], [1], [0, 0, 1, 1], [], []>} : vector<2x128xf32>, vector<128x512xf32>, vector<2x512xf32> -> vector<2x512xf32>
    %c0_12 = arith.constant 0 : index
    %c0_13 = arith.constant 0 : index
    %27 = vector.load %arg7[%c0_12, %c0_13] : memref<1x512xf32, #tpu.memory_space<vmem>>, vector<1x512xf32>
    %28 = vector.broadcast %27 : vector<1x512xf32> to vector<2x512xf32>
    %29 = arith.addf %26, %28 : vector<2x512xf32>
    %30 = vector.extract_strided_slice %29 {offsets = [0, 0], sizes = [2, 8], strides = [1, 1]} : vector<2x512xf32> to vector<2x8xf32>
    %cst_14 = arith.constant dense<0xFF800000> : vector<2xf32>
    %31 = vector.multi_reduction <maximumf>, %30, %cst_14 [1] : vector<2x8xf32> to vector<2xf32>
    %32 = vector.shape_cast %31 : vector<2xf32> to vector<2x1xf32>
    %33 = vector.broadcast %32 : vector<2x1xf32> to vector<2x8xf32>
    %34 = arith.subf %30, %33 : vector<2x8xf32>
    %35 = math.exp %34 : vector<2x8xf32>
    %cst_15 = arith.constant dense<0.000000e+00> : vector<2xf32>
    %36 = vector.multi_reduction <add>, %35, %cst_15 [1] : vector<2x8xf32> to vector<2xf32>
    %37 = vector.shape_cast %36 : vector<2xf32> to vector<2x1xf32>
    %38 = vector.broadcast %37 : vector<2x1xf32> to vector<2x8xf32>
    %39 = arith.divf %35, %38 : vector<2x8xf32>
    %40 = vector.extract_strided_slice %29 {offsets = [0, 128], sizes = [2, 8], strides = [1, 1]} : vector<2x512xf32> to vector<2x8xf32>
    %cst_16 = arith.constant dense<0xFF800000> : vector<2xf32>
    %41 = vector.multi_reduction <maximumf>, %40, %cst_16 [1] : vector<2x8xf32> to vector<2xf32>
    %42 = vector.shape_cast %41 : vector<2xf32> to vector<2x1xf32>
    %43 = vector.broadcast %42 : vector<2x1xf32> to vector<2x8xf32>
    %44 = arith.subf %40, %43 : vector<2x8xf32>
    %45 = math.exp %44 : vector<2x8xf32>
    %cst_17 = arith.constant dense<0.000000e+00> : vector<2xf32>
    %46 = vector.multi_reduction <add>, %45, %cst_17 [1] : vector<2x8xf32> to vector<2xf32>
    %47 = vector.shape_cast %46 : vector<2xf32> to vector<2x1xf32>
    %48 = vector.broadcast %47 : vector<2x1xf32> to vector<2x8xf32>
    %49 = arith.divf %45, %48 : vector<2x8xf32>
    %50 = vector.extract_strided_slice %29 {offsets = [0, 256], sizes = [2, 8], strides = [1, 1]} : vector<2x512xf32> to vector<2x8xf32>
    %cst_18 = arith.constant dense<0xFF800000> : vector<2xf32>
    %51 = vector.multi_reduction <maximumf>, %50, %cst_18 [1] : vector<2x8xf32> to vector<2xf32>
    %52 = vector.shape_cast %51 : vector<2xf32> to vector<2x1xf32>
    %53 = vector.broadcast %52 : vector<2x1xf32> to vector<2x8xf32>
    %54 = arith.subf %50, %53 : vector<2x8xf32>
    %55 = math.exp %54 : vector<2x8xf32>
    %cst_19 = arith.constant dense<0.000000e+00> : vector<2xf32>
    %56 = vector.multi_reduction <add>, %55, %cst_19 [1] : vector<2x8xf32> to vector<2xf32>
    %57 = vector.shape_cast %56 : vector<2xf32> to vector<2x1xf32>
    %58 = vector.broadcast %57 : vector<2x1xf32> to vector<2x8xf32>
    %59 = arith.divf %55, %58 : vector<2x8xf32>
    %60 = vector.extract_strided_slice %29 {offsets = [0, 384], sizes = [2, 8], strides = [1, 1]} : vector<2x512xf32> to vector<2x8xf32>
    %cst_20 = arith.constant dense<0xFF800000> : vector<2xf32>
    %61 = vector.multi_reduction <maximumf>, %60, %cst_20 [1] : vector<2x8xf32> to vector<2xf32>
    %62 = vector.shape_cast %61 : vector<2xf32> to vector<2x1xf32>
    %63 = vector.broadcast %62 : vector<2x1xf32> to vector<2x8xf32>
    %64 = arith.subf %60, %63 : vector<2x8xf32>
    %65 = math.exp %64 : vector<2x8xf32>
    %cst_21 = arith.constant dense<0.000000e+00> : vector<2xf32>
    %66 = vector.multi_reduction <add>, %65, %cst_21 [1] : vector<2x8xf32> to vector<2xf32>
    %67 = vector.shape_cast %66 : vector<2xf32> to vector<2x1xf32>
    %68 = vector.broadcast %67 : vector<2x1xf32> to vector<2x8xf32>
    %69 = arith.divf %65, %68 : vector<2x8xf32>
    %70 = tpu.concatenate %39, %49, %59, %69 in 1 : vector<2x8xf32>, vector<2x8xf32>, vector<2x8xf32>, vector<2x8xf32> -> vector<2x32xf32>
    %c0_22 = arith.constant 0 : index
    %c0_23 = arith.constant 0 : index
    %71 = vector.load %arg8[%c0_22, %c0_23] : memref<2x32xf32, #tpu.memory_space<vmem>>, vector<2x32xf32>
    tpu.vector_store %arg8[%c0_22, %c0_23], %70 {strides = array<i32>} : memref<2x32xf32, #tpu.memory_space<vmem>>, vector<2x32xf32>,
    return
  }
  func.func @transform_0(%arg0: i32) -> (i32, i32) {
    %c0_i32 = arith.constant 0 : i32
    %c0_i32_0 = arith.constant 0 : i32
    return %arg0, %c0_i32 : i32, i32
  }
  func.func @transform_1(%arg0: i32) -> (i32, i32) {
    %c0_i32 = arith.constant 0 : i32
    %c0_i32_0 = arith.constant 0 : i32
    return %arg0, %c0_i32 : i32, i32
  }
  func.func @transform_2(%arg0: i32) -> (i32, i32) {
    %c0_i32 = arith.constant 0 : i32
    %c0_i32_0 = arith.constant 0 : i32
    %c0_i32_1 = arith.constant 0 : i32
    return %c0_i32, %c0_i32_0 : i32, i32
  }
  func.func @transform_3(%arg0: i32) -> (i32, i32) {
    %c0_i32 = arith.constant 0 : i32
    %c0_i32_0 = arith.constant 0 : i32
    %c0_i32_1 = arith.constant 0 : i32
    return %c0_i32, %c0_i32_0 : i32, i32
  }
  func.func @transform_4(%arg0: i32) -> (i32, i32) {
    %c0_i32 = arith.constant 0 : i32
    %c0_i32_0 = arith.constant 0 : i32
    %c0_i32_1 = arith.constant 0 : i32
    return %c0_i32, %c0_i32_0 : i32, i32
  }
  func.func @transform_5(%arg0: i32) -> (i32, i32) {
    %c0_i32 = arith.constant 0 : i32
    %c0_i32_0 = arith.constant 0 : i32
    %c0_i32_1 = arith.constant 0 : i32
    return %c0_i32, %c0_i32_0 : i32, i32
  }
  func.func @transform_6(%arg0: i32) -> (i32, i32) {
    %c0_i32 = arith.constant 0 : i32
    %c0_i32_0 = arith.constant 0 : i32
    %c0_i32_1 = arith.constant 0 : i32
    return %c0_i32, %c0_i32_0 : i32, i32
  }
  func.func @transform_7(%arg0: i32) -> (i32, i32) {
    %c0_i32 = arith.constant 0 : i32
    %c0_i32_0 = arith.constant 0 : i32
    return %arg0, %c0_i32 : i32, i32
  }
}

</mosaic_0001>

<bundles_post_ra>
// kernel: tile.24
= control target key start
LH: loop header
LB: loop body
LE: loop exit
PB: predicated region body
PF: predicated region fallthrough
CT: control target
= control target key end

     0   :  { %vm16_vm0 = vcmask 261120   ;;  %s49_s12 = smov 32   ;;  %s50_s13 = smov 64   ;;  %vm22_vm1 = vcmask 1048320   ;;  %vm28_vm2 = vcmask 785920   ;;  %vm34_vm3 = vcmask 523520   ;;  %s73_s0 = inlined_call_operand.vmem [shape: f32[3,4,32], index: 0, kind: input, shape index: {}]   ;;  %s74_s1 = inlined_call_operand.vmem [shape: f32[3,128], index: 1, kind: output, shape index: {}]  }
   0x1   :  { %v43_v0 = vld [vmem:[%s73_s0 + $0x8] sm:$0xf]  ;;  %v44_v1 = vld [vmem:[%s73_s0 + $0x4] sm:$0xf]  ;;  %v13_v2 = vld [vmem:[%s73_s0] sm:$0xf] }
   0x2   :  { %8 = vst [vmem:[#allocation1 + $0x10] sm:$0xf] %v43_v0  ;;  %12 = vst [vmem:[#allocation1 + $0x8] sm:$0xf] %v44_v1  ;;  %s48_s0 = smov 96  }
   0x3   :  { %14 = vst [vmem:[#allocation1] sm:$0xf] %v13_v2 }
   0xa   :  { %v19_v3 = vld [vmem:[#allocation1 + $0x3] ss:$8 sm:$0x7]   ;;  %v31_v4 = vld [vmem:[#allocation1 + $0x1] ss:$8 sm:$0x7]  }
   0xb   :  { %20 = vrot.lane.b32.xlu0 %v19_v3, %s48_s0  ;;  %v15_v5 = vld [vmem:[#allocation1] ss:$8 sm:$0x7]   ;;  %v25_v6 = vld [vmem:[#allocation1 + $0x2] ss:$8 sm:$0x7]   ;;  %32 = vrot.lane.b32.xlu1 %v31_v4, %s49_s12 }
   0xc   :  { %17 = vst.msk [vmem:[#allocation0] sm:$0x7] %vm16_vm0, %v15_v5  }
   0xf   :  { %26 = vrot.lane.b32.xlu0 %v25_v6, %s50_s13 }
  0x7d   :  { %v21_v7 = vpop.permute.xlu0 %20   ;;  %v33_v8 = vpop.permute.xlu1 %32  }
  0x7e   :  { %23 = vst.msk [vmem:[#allocation0] sm:$0x7] %vm22_vm1, %v21_v7  }
  0x81   :  { %v27_v9 = vpop.permute.xlu0 %26  }
  0x82   :  { %29 = vst.msk [vmem:[#allocation0] sm:$0x7] %vm28_vm2, %v27_v9  }
  0x83   :  { %35 = vst.msk [vmem:[#allocation0] sm:$0x7] %vm34_vm3, %v33_v8  }
  0x8a   :  { %v39_v10 = vld [vmem:[#allocation0] sm:$0xf] }
  0x8b   :  { %41 = vst [vmem:[%s74_s1] sm:$0xf] %v39_v10 }

// kernel: match_classify.1
= control target key start
LH: loop header
LB: loop body
LE: loop exit
PB: predicated region body
PF: predicated region fallthrough
CT: control target
= control target key end

     0   :  { %v611_v0 = vmov 0.0|0.0   ;;  %vm612_vm0 = vmmov 0   ;;  %v613_v4 = vmov 0.0   ;;  %vm373_vm1 = vcmask 58368   ;;  %s616_s21 = smov 24   ;;  %s934_s2 = inlined_call_operand.vmem [shape: f32[128,128], index: 2, kind: input, shape index: {}]   ;;  %s935_s5 = inlined_call_operand.vmem [shape: f32[128,512], index: 5, kind: input, shape index: {}]   ;;  %s936_s1 = inlined_call_operand.vmem [shape: f32[2,128], index: 1, kind: input, shape index: {}]   ;;  %s937_s3 = inlined_call_operand.vmem [shape: f32[1,128], index: 3, kind: input, shape index: {}]   ;;  %s938_s4 = inlined_call_operand.vmem [shape: f32[3,128], index: 4, kind: input, shape index: {}]   ;;  %s939_s0 = inlined_call_operand.vmem [shape: f32[2,128], index: 0, kind: input, shape index: {}]   ;;  %s940_s6 = inlined_call_operand.vmem [shape: f32[1,512], index: 6, kind: input, shape index: {}]   ;;  %s941_s7 = inlined_call_operand.vmem [shape: f32[2,32], index: 7, kind: output, shape index: {}]  }
   0x1   :  { %495 = vmatprep.subr.bf16.mxu0 %v611_v0  ;;  %v27_v1 = vld [vmem:[%s934_s2] sm:$0xff]  ;;  %v28_v2 = vld [vmem:[%s934_s2 + $0x8] sm:$0xff]  ;;  %v29_v3 = vld [vmem:[%s934_s2 + $0x10] sm:$0xff]  ;;  %492 = vmatprep.mubr.msk.f32.mxu0 %vm612_vm0, %v613_v4  ;;  %vm430_vm2 = vcmask 64512   ;;  %vm432_vm3 = vcmask 130048   ;;  %vm434_vm4 = vcmask 195584  }
   0x2   :  { %v496_v5 = vpack.c.bf16 %v28_v2, %v27_v1  ;;  %v30_v6 = vld [vmem:[%s934_s2 + $0x18] sm:$0xff]  ;;  %295 = vmatprep.mubr.f32.mxu1 %v613_v4  ;;  %v31_v8 = vld [vmem:[%s934_s2 + $0x20] sm:$0xff]  ;;  %v32_v9 = vld [vmem:[%s934_s2 + $0x28] sm:$0xff]  ;;  %vm436_vm5 = vcmask 254976  }
   0x3   :  { %v499_v7 = vpack.c.bf16 %v30_v6, %v29_v3  ;;  %v146_v10 = vld [vmem:[%s935_s5 + $0x8] sm:$0xff]  ;;  %v502_v12 = vpack.c.bf16 %v32_v9, %v31_v8  ;;  %v33_v13 = vld [vmem:[%s934_s2 + $0x30] sm:$0xff]  ;;  %v145_v15 = vld [vmem:[%s935_s5] sm:$0xff] }
   0x4   :  { %497 = vmatpush3.bf16.msra.mxu0 %v496_v5  ;;  %v150_v11 = vld [vmem:[%s935_s5 + $0x28] sm:$0xff]  ;;  %v149_v16 = vld [vmem:[%s935_s5 + $0x20] sm:$0xff]  ;;  %v34_v17 = vld [vmem:[%s934_s2 + $0x38] sm:$0xff] }
   0x5   :  { %498 = vmatprep.subr.bf16.mxu0 %v611_v0  ;;  %v519_v14 = vpack.c.bf16 %v150_v11, %v146_v10  ;;  %v521_v18 = vpack.c.bf16 %v149_v16, %v145_v15  ;;  %v154_v19 = vld [vmem:[%s935_s5 + $0x48] sm:$0xff]  ;;  %v153_v22 = vld [vmem:[%s935_s5 + $0x40] sm:$0xff]  ;;  %v505_v24 = vpack.c.bf16 %v34_v17, %v33_v13  ;;  %v37_v35 = vld [vmem:[%s934_s2 + $0x50] sm:$0xff] }
   0x6   :  { %v158_v20 = vld [vmem:[%s935_s5 + $0x68] sm:$0xff]  ;;  %v157_v23 = vld [vmem:[%s935_s5 + $0x60] sm:$0xff]  ;;  %v38_v36 = vld [vmem:[%s934_s2 + $0x58] sm:$0xff] }
   0x7   :  { %520 = vmatprep.subr.bf16.mxu1 %v519_v14  ;;  %v523_v21 = vpack.c.bf16 %v158_v20, %v154_v19  ;;  %v35_v25 = vld [vmem:[%s934_s2 + $0x40] sm:$0xff]  ;;  %v525_v26 = vpack.c.bf16 %v157_v23, %v153_v22  ;;  %v162_v27 = vld [vmem:[%s935_s5 + $0x88] sm:$0xff]  ;;  %v511_v37 = vpack.c.bf16 %v38_v36, %v37_v35  ;;  %v41_v41 = vld [vmem:[%s934_s2 + $0x70] sm:$0xff] }
   0x8   :  { %500 = vmatpush3.bf16.msra.mxu0 %v499_v7  ;;  %522 = vmatpush1.bf16.msra.mxu1 %v521_v18  ;;  %v166_v28 = vld [vmem:[%s935_s5 + $0xa8] sm:$0xff]  ;;  %v161_v31 = vld [vmem:[%s935_s5 + $0x80] sm:$0xff]  ;;  %v42_v42 = vld [vmem:[%s934_s2 + $0x78] sm:$0xff] }
   0x9   :  { %501 = vmatprep.subr.bf16.mxu0 %v611_v0  ;;  %524 = vmatprep.subr.bf16.mxu1 %v523_v21  ;;  %v36_v29 = vld [vmem:[%s934_s2 + $0x48] sm:$0xff]  ;;  %v527_v30 = vpack.c.bf16 %v166_v28, %v162_v27  ;;  %v165_v32 = vld [vmem:[%s935_s5 + $0xa0] sm:$0xff]  ;;  %v148_v43 = vld [vmem:[%s935_s5 + $0x18] sm:$0xff]  ;;  %v517_v45 = vpack.c.bf16 %v42_v42, %v41_v41 }
   0xa   :  { %v529_v33 = vpack.c.bf16 %v165_v32, %v161_v31  ;;  %v508_v34 = vpack.c.bf16 %v36_v29, %v35_v25  ;;  %v39_v38 = vld [vmem:[%s934_s2 + $0x60] sm:$0xff]  ;;  %v40_v39 = vld [vmem:[%s934_s2 + $0x68] sm:$0xff]  ;;  %v152_v44 = vld [vmem:[%s935_s5 + $0x38] sm:$0xff] }
   0xb   :  { %v514_v40 = vpack.c.bf16 %v40_v39, %v39_v38  ;;  %v551_v46 = vpack.c.bf16 %v152_v44, %v148_v43  ;;  %v147_v47 = vld [vmem:[%s935_s5 + $0x10] sm:$0xff]  ;;  %v156_v49 = vld [vmem:[%s935_s5 + $0x58] sm:$0xff]  ;;  %v26_v51 = vld [vmem:[%s936_s1] sm:$0x3] }
   0xc   :  { %503 = vmatpush3.bf16.msra.mxu0 %v502_v12  ;;  %526 = vmatpush1.bf16.msra.mxu1 %v525_v26  ;;  %v151_v48 = vld [vmem:[%s935_s5 + $0x30] sm:$0xff]  ;;  %v160_v50 = vld [vmem:[%s935_s5 + $0x78] sm:$0xff]  ;;  %v170_v63 = vld [vmem:[%s935_s5 + $0xc8] sm:$0xff] }
   0xd   :  { %504 = vmatprep.subr.bf16.mxu0 %v611_v0  ;;  %528 = vmatprep.subr.bf16.mxu1 %v527_v30  ;;  %v553_v52 = vpack.c.bf16 %v151_v48, %v147_v47  ;;  %v555_v53 = vpack.c.bf16 %v160_v50, %v156_v49  ;;  %v155_v54 = vld [vmem:[%s935_s5 + $0x50] sm:$0xff]  ;;  %v164_v56 = vld [vmem:[%s935_s5 + $0x98] sm:$0xff]  ;;  %v173_v5 = vld [vmem:[%s935_s5 + $0xe0] sm:$0xff] }
   0xe   :  { %v159_v55 = vld [vmem:[%s935_s5 + $0x70] sm:$0xff]  ;;  %v168_v57 = vld [vmem:[%s935_s5 + $0xb8] sm:$0xff]  ;;  %v178_v11 = vld [vmem:[%s935_s5 + $0x108] sm:$0xff] }
   0xf   :  { %v557_v58 = vpack.c.bf16 %v159_v55, %v155_v54  ;;  %v559_v59 = vpack.c.bf16 %v168_v57, %v164_v56  ;;  %v163_v60 = vld [vmem:[%s935_s5 + $0x90] sm:$0xff]  ;;  %v172_v1 = vld [vmem:[%s935_s5 + $0xd8] sm:$0xff]  ;;  %v182_v12 = vld [vmem:[%s935_s5 + $0x128] sm:$0xff] }
  0x10   :  { %506 = vmatpush3.bf16.msra.mxu0 %v505_v24  ;;  %530 = vmatpush1.bf16.msra.mxu1 %v529_v33  ;;  %v167_v61 = vld [vmem:[%s935_s5 + $0xb0] sm:$0xff]  ;;  %v176_v3 = vld [vmem:[%s935_s5 + $0xf8] sm:$0xff]  ;;  %v535_v14 = vpack.c.bf16 %v182_v12, %v178_v11  ;;  %v177_v16 = vld [vmem:[%s935_s5 + $0x100] sm:$0xff] }
  0x11   :  { %507 = vmatprep.subr.bf16.mxu0 %v611_v0  ;;  %v561_v62 = vpack.c.bf16 %v167_v61, %v163_v60  ;;  %v563_v6 = vpack.c.bf16 %v176_v3, %v172_v1  ;;  %v171_v8 = vld [vmem:[%s935_s5 + $0xd0] sm:$0xff]  ;;  %v180_v13 = vld [vmem:[%s935_s5 + $0x118] sm:$0xff]  ;;  %v181_v17 = vld [vmem:[%s935_s5 + $0x120] sm:$0xff] }
  0x12   :  { %v175_v9 = vld [vmem:[%s935_s5 + $0xf0] sm:$0xff]  ;;  %v184_v15 = vld [vmem:[%s935_s5 + $0x138] sm:$0xff]  ;;  %v537_v19 = vpack.c.bf16 %v181_v17, %v177_v16  ;;  %v186_v23 = vld [vmem:[%s935_s5 + $0x148] sm:$0xff] }
  0x13   :  { %v565_v10 = vpack.c.bf16 %v175_v9, %v171_v8  ;;  %v567_v18 = vpack.c.bf16 %v184_v15, %v180_v13  ;;  %v179_v20 = vld [vmem:[%s935_s5 + $0x110] sm:$0xff]  ;;  %v190_v24 = vld [vmem:[%s935_s5 + $0x168] sm:$0xff]  ;;  %v188_v25 = vld [vmem:[%s935_s5 + $0x158] sm:$0xff] }
  0x14   :  { %509 = vmatpush3.bf16.msra.mxu0 %v508_v34  ;;  %v183_v21 = vld [vmem:[%s935_s5 + $0x130] sm:$0xff]  ;;  %v539_v26 = vpack.c.bf16 %v190_v24, %v186_v23  ;;  %v192_v27 = vld [vmem:[%s935_s5 + $0x178] sm:$0xff]  ;;  %v185_v28 = vld [vmem:[%s935_s5 + $0x140] sm:$0xff] }
  0x15   :  { %510 = vmatprep.subr.bf16.mxu0 %v611_v0  ;;  %v569_v22 = vpack.c.bf16 %v183_v21, %v179_v20  ;;  %v189_v29 = vld [vmem:[%s935_s5 + $0x160] sm:$0xff]  ;;  %v571_v30 = vpack.c.bf16 %v192_v27, %v188_v25  ;;  %v187_v32 = vld [vmem:[%s935_s5 + $0x150] sm:$0xff]  ;;  %v194_v34 = vld [vmem:[%s935_s5 + $0x188] sm:$0xff] }
  0x16   :  { %v541_v31 = vpack.c.bf16 %v189_v29, %v185_v28  ;;  %v191_v33 = vld [vmem:[%s935_s5 + $0x170] sm:$0xff]  ;;  %v198_v36 = vld [vmem:[%s935_s5 + $0x1a8] sm:$0xff]  ;;  %v200_v38 = vld [vmem:[%s935_s5 + $0x1b8] sm:$0xff] }
  0x17   :  { %v573_v35 = vpack.c.bf16 %v191_v33, %v187_v32  ;;  %v543_v39 = vpack.c.bf16 %v198_v36, %v194_v34  ;;  %v193_v41 = vld [vmem:[%s935_s5 + $0x180] sm:$0xff]  ;;  %v195_v43 = vld [vmem:[%s935_s5 + $0x190] sm:$0xff]  ;;  %v206_v47 = vld [vmem:[%s935_s5 + $0x1e8] sm:$0xff] }
  0x18   :  { %512 = vmatpush3.bf16.msra.mxu0 %v511_v37  ;;  %v196_v37 = vld [vmem:[%s935_s5 + $0x198] sm:$0xff]  ;;  %v197_v42 = vld [vmem:[%s935_s5 + $0x1a0] sm:$0xff]  ;;  %v203_v55 = vld [vmem:[%s935_s5 + $0x1d0] sm:$0xff] }
  0x19   :  { %513 = vmatprep.subr.bf16.mxu0 %v611_v0  ;;  %v545_v44 = vpack.c.bf16 %v197_v42, %v193_v41  ;;  %v204_v50 = vld [vmem:[%s935_s5 + $0x1d8] sm:$0xff]  ;;  %v205_v54 = vld [vmem:[%s935_s5 + $0x1e0] sm:$0xff]  ;;  %v207_v56 = vld [vmem:[%s935_s5 + $0x1f0] sm:$0xff] }
  0x1a   :  { %v120_v3 = vld [vmem:[%s939_s0] sm:$0x3] }
  0x1b   :  { %v209_v20 = vld [vmem:[%s940_s6] sm:$0xf]  ;;  %s615_s6 = smov 16  }
  0x1c   :  { %515 = vmatpush3.bf16.msra.mxu0 %v514_v40  ;;  %v575_v40 = vpack.c.bf16 %v200_v38, %v196_v37 }
  0x1d   :  { %516 = vmatprep.subr.bf16.mxu0 %v611_v0  ;;  %v174_v0 = vld [vmem:[%s935_s5 + $0xe8] sm:$0xff] }
  0x1e   :  { %v531_v2 = vpack.c.bf16 %v174_v0, %v170_v63  ;;  %v442_v63 = vld [vmem:[%s937_s3] ss:$0 sm:$0xff] }
  0x1f   :  { %v121_v0 = vld [vmem:[%s938_s4] sm:$0x7]  ;;  %s614_s4 = smov 8  }
  0x20   :  { %518 = vmatpush3.bf16.msra.mxu0 %v517_v45  ;;  %532 = vmatprep.subr.bf16.mxu1 %v531_v2  ;;  %v199_v45 = vld [vmem:[%s935_s5 + $0x1b0] sm:$0xff] }
  0x21   :  { %552 = vmatprep.subr.bf16.mxu0 %v551_v46  ;;  %v202_v46 = vld [vmem:[%s935_s5 + $0x1c8] sm:$0xff]  ;;  %v577_v48 = vpack.c.bf16 %v199_v45, %v195_v43 }
  0x22   :  { %v547_v49 = vpack.c.bf16 %v206_v47, %v202_v46 }
  0x23   :  { %493 = vmatmul.mubr.f32.vlgmr.msra.gmra.mrb[0].mxu0 %v26_v51  ;;  %v208_v51 = vld [vmem:[%s935_s5 + $0x1f8] sm:$0xff] }
  0x24   :  { %554 = vmatpush1.bf16.msra.mxu0 %v553_v52  ;;  %366 = vmatprep.mubr.f32.mxu0 %v613_v4  ;;  %v169_v4 = vld [vmem:[%s935_s5 + $0xc0] sm:$0xff] }
  0x25   :  { %556 = vmatprep.subr.bf16.mxu0 %v555_v53  ;;  %v533_v7 = vpack.c.bf16 %v173_v5, %v169_v4  ;;  %v201_v52 = vld [vmem:[%s935_s5 + $0x1c0] sm:$0xff]  ;;  %v579_v53 = vpack.c.bf16 %v208_v51, %v204_v50 }
  0x26   :  { %v549_v57 = vpack.c.bf16 %v205_v54, %v201_v52 }
  0x27   :  { %534 = vmatpush1.bf16.msra.mxu1 %v533_v7 }
  0x28   :  { %558 = vmatpush1.bf16.msra.mxu0 %v557_v58  ;;  %536 = vmatprep.subr.bf16.mxu1 %v535_v14  ;;  %v581_v58 = vpack.c.bf16 %v207_v56, %v203_v55 }
  0x29   :  { %560 = vmatprep.subr.bf16.mxu0 %v559_v59  ;;  %v123_v59 = vlaneseq }
  0x2b   :  { %538 = vmatpush1.bf16.msra.mxu1 %v537_v19  ;;  %v124_v60 = vshrl.u32 %v123_v59, 7 }
  0x2c   :  { %562 = vmatpush1.bf16.msra.mxu0 %v561_v62  ;;  %540 = vmatprep.subr.bf16.mxu1 %v539_v26 }
  0x2d   :  { %564 = vmatprep.subr.bf16.mxu0 %v563_v6  ;;  %v125_v61 = vsub.s32 0, %v124_v60  ;;  %v132_v62 = vsub.s32 1, %v124_v60  ;;  %v140_v1 = vsub.s32 2, %v124_v60  ;;  %v225_v21 = vsub.s32 3, %v124_v60 }
  0x2f   :  { %542 = vmatpush1.bf16.msra.mxu1 %v541_v31  ;;  %v126_v5 = vrot.slane %v121_v0, %v125_v61  ;;  %v133_v6 = vrot.slane %v121_v0, %v132_v62  ;;  %v141_v8 = vrot.slane %v121_v0, %v140_v1  ;;  %v218_v23 = vrot.slane %v209_v20, %v132_v62 }
  0x30   :  { %566 = vmatpush1.bf16.msra.mxu0 %v565_v10  ;;  %544 = vmatprep.subr.bf16.mxu1 %v543_v39  ;;  %v226_v24 = vrot.slane %v209_v20, %v225_v21  ;;  %v222_v26 = vrot.slane %v209_v20, %v140_v1 }
  0x31   :  { %568 = vmatprep.subr.bf16.mxu0 %v567_v18 }
  0x33   :  { %546 = vmatpush1.bf16.msra.mxu1 %v545_v44 }
  0x34   :  { %570 = vmatpush1.bf16.msra.mxu0 %v569_v22  ;;  %548 = vmatprep.subr.bf16.mxu1 %v547_v49  ;;  %v214_v22 = vrot.slane %v209_v20, %v125_v61 }
  0x35   :  { %572 = vmatprep.subr.bf16.mxu0 %v571_v30 }
  0x37   :  { %550 = vmatpush1.bf16.msra.mxu1 %v549_v57 }
  0x38   :  { %574 = vmatpush1.bf16.msra.mxu0 %v573_v35 }
  0x39   :  { %576 = vmatprep.subr.bf16.mxu0 %v575_v40 }
  0x3c   :  { %578 = vmatpush1.bf16.msra.mxu0 %v577_v48 }
  0x3d   :  { %580 = vmatprep.subr.bf16.mxu0 %v579_v53 }
  0x40   :  { %582 = vmatpush1.bf16.msra.mxu0 %v581_v58 }
  0xf6   :  { %v116_v2 = vpop.f32.mrb[0].mxu0 }
  0xf7   :  { %v117_v4 = vadd.f32 %v442_v63, %v116_v2  ;;  %v494_v7 = vpop.f32.mrb[1].mxu0 }
  0xf9   :  { %v122_v9 = vadd.f32 %v120_v3, %v117_v4  ;;  %v129_v10 = vsub.f32 %v120_v3, %v117_v4  ;;  %v137_v11 = vmul.f32 %v120_v3, %v117_v4 }
  0xfb   :  { %v127_v12 = vmul.f32 %v126_v5, %v122_v9  ;;  %v134_v13 = vmul.f32 %v133_v6, %v129_v10  ;;  %v142_v14 = vmul.f32 %v141_v8, %v137_v11 }
  0xfd   :  { %589 = vtanh.f32 %v127_v12 }
  0xfe   :  { %591 = vtanh.f32 %v134_v13 }
  0xff   :  { %593 = vtanh.f32 %v142_v14 }
 0x107   :  { %v590_v15 = vpop.eup %589 }
 0x108   :  { %v592_v16 = vpop.eup %591 }
 0x109   :  { %v136_v17 = vadd.f32 %v592_v16, %v590_v15  ;;  %v594_v18 = vpop.eup %593 }
 0x10b   :  { %v144_v19 = vadd.f32 %v594_v18, %v136_v17 }
 0x10d   :  { %296 = vmatmul.mubr.f32.vlgmr.msra.gmra.mrb[0].mxu1 %v144_v19  ;;  %367 = vmatmul.mubr.f32.vlgmr.msra.gmra.mrb[2].mxu0 %v144_v19 }
 0x1e0   :  { %v297_v25 = vpop.f32.mrb[0].mxu1  ;;  %v368_v27 = vpop.f32.mrb[2].mxu0 }
 0x1e1   :  { %v298_v28 = vadd.f32 %v297_v25, %v214_v22  ;;  %v299_v29 = vpop.f32.mrb[1].mxu1  ;;  %v370_v30 = vpop.f32.mrb[3].mxu0  ;;  %v369_v33 = vadd.f32 %v368_v27, %v222_v26 }
 0x1e2   :  { %v300_v31 = vadd.f32 %v299_v29, %v218_v23  ;;  %v371_v32 = vadd.f32 %v370_v30, %v226_v24 }
 0x1e3   :  { %v396_v36 = vsel %vm373_vm1, %v369_v33, -inf  ;;  %v374_v37 = vsel %vm373_vm1, %v298_v28, -inf }
 0x1e4   :  { %v407_v34 = vsel %vm373_vm1, %v371_v32, -inf  ;;  %v385_v35 = vsel %vm373_vm1, %v300_v31, -inf }
 0x1e5   :  { %408 = vmax.xlane.f32.xlu1 %v407_v34  ;;  %386 = vmax.xlane.f32.xlu0 %v385_v35 }
 0x1e9   :  { %397 = vmax.xlane.f32.xlu0 %v396_v36  ;;  %375 = vmax.xlane.f32.xlu1 %v374_v37 }
 0x272   :  { %v409_v38 = vpop.xlane.xlu1 %408  ;;  %v387_v39 = vpop.xlane.xlu0 %386 }
 0x273   :  { %v410_v40 = vsub.f32 %v371_v32, %v409_v38  ;;  %v388_v41 = vsub.f32 %v300_v31, %v387_v39 }
 0x275   :  { %v389_v42 = vmul.f32 1.442695, %v388_v41  ;;  %v411_v43 = vmul.f32 1.442695, %v410_v40 }
 0x276   :  { %v398_v44 = vpop.xlane.xlu0 %397  ;;  %v376_v45 = vpop.xlane.xlu1 %375 }
 0x277   :  { %v399_v46 = vsub.f32 %v369_v33, %v398_v44  ;;  %v377_v47 = vsub.f32 %v298_v28, %v376_v45  ;;  %595 = vpow2.f32 %v389_v42 }
 0x278   :  { %597 = vpow2.f32 %v411_v43 }
 0x279   :  { %v400_v48 = vmul.f32 1.442695, %v399_v46  ;;  %v378_v49 = vmul.f32 1.442695, %v377_v47 }
 0x27b   :  { %599 = vpow2.f32 %v400_v48 }
 0x27c   :  { %601 = vpow2.f32 %v378_v49 }
 0x281   :  { %v596_v50 = vpop.eup %595 }
 0x282   :  { %v391_v51 = vsel %vm373_vm1, %v596_v50, 0.0  ;;  %v598_v52 = vpop.eup %597 }
 0x283   :  { %392 = vadd.xlane.f32.xlu0 %v391_v51  ;;  %v413_v56 = vsel %vm373_vm1, %v598_v52, 0.0 }
 0x285   :  { %v600_v53 = vpop.eup %599 }
 0x286   :  { %v402_v54 = vsel %vm373_vm1, %v600_v53, 0.0  ;;  %v602_v55 = vpop.eup %601 }
 0x287   :  { %403 = vadd.xlane.f32.xlu1 %v402_v54  ;;  %414 = vadd.xlane.f32.xlu0 %v413_v56  ;;  %v380_v57 = vsel %vm373_vm1, %v602_v55, 0.0 }
 0x28b   :  { %381 = vadd.xlane.f32.xlu1 %v380_v57 }
 0x310   :  { %v393_v58 = vpop.xlane.xlu0 %392 }
 0x311   :  { %603 = vrcp.f32 %v393_v58 }
 0x314   :  { %v404_v59 = vpop.xlane.xlu1 %403  ;;  %v415_v60 = vpop.xlane.xlu0 %414 }
 0x315   :  { %605 = vrcp.f32 %v404_v59 }
 0x316   :  { %607 = vrcp.f32 %v415_v60 }
 0x318   :  { %v382_v3 = vpop.xlane.xlu1 %381 }
 0x319   :  { %609 = vrcp.f32 %v382_v3 }
 0x31b   :  { %v604_v61 = vpop.eup %603 }
 0x31c   :  { %v395_v62 = vmul.f32 %v604_v61, %v596_v50 }
 0x31e   :  { %419 = vrot.lane.b32.xlu0 %v395_v62, %s614_s4 }
 0x31f   :  { %v606_v63 = vpop.eup %605 }
 0x320   :  { %v406_v0 = vmul.f32 %v606_v63, %v600_v53  ;;  %v608_v1 = vpop.eup %607 }
 0x321   :  { %v417_v2 = vmul.f32 %v608_v1, %v598_v52 }
 0x322   :  { %423 = vrot.lane.b32.xlu1 %v406_v0, %s615_s6 }
 0x323   :  { %v610_v4 = vpop.eup %609 }
 0x324   :  { %v384_v7 = vmul.f32 %v610_v4, %v602_v55 }
 0x326   :  { %427 = vrot.lane.b32.xlu1 %v417_v2, %s616_s21 }
 0x390   :  { %v420_v5 = vpop.permute.xlu0 %419 }
 0x391   :  { %v431_v8 = vsel %vm430_vm2, %v384_v7, %v420_v5 }
 0x394   :  { %v424_v6 = vpop.permute.xlu1 %423 }
 0x395   :  { %v433_v9 = vsel %vm432_vm3, %v431_v8, %v424_v6 }
 0x398   :  { %v428_v10 = vpop.permute.xlu1 %427 }
 0x399   :  { %v435_v11 = vsel %vm434_vm4, %v433_v9, %v428_v10 }
 0x39a   :  { %437 = vst.msk [vmem:[%s941_s7] sm:$0x3] %vm436_vm5, %v435_v11 }

</bundles_post_ra>
